<compile_context>
chip_gen: v5e
topology: v5e:2x2
jax: 0.10.0
libtpu: 0.0.40
codegen_flags: <defaults>
</compile_context>

<pallas_src>
import functools

import jax
import jax.numpy as jnp
from jax.experimental import pallas as pl
from jax.experimental.pallas import tpu as pltpu

LN_EPS = 1e-5  # nn.LayerNorm default


def _round_up(a, b):
    return (a + b - 1) // b * b


def _patch_embed_kernel(p_ref, w_ref, aux_ref, o_ref):
    # p_ref:   (tm, Kp)  bf16 patches tile (streamed over the grid)
    # w_ref:   (Kp, E)   bf16 projection weight (resident across the grid)
    # aux_ref: (3, E)    f32 [bias; ln_gamma; ln_beta] (resident)
    # o_ref:   (tm, E)   f32 output tile (lane-dense: E is a multiple of 128)
    y = jnp.dot(p_ref[...], w_ref[...], preferred_element_type=jnp.float32)
    y = y + aux_ref[0:1, :]

    # Single-pass LayerNorm statistics: two independent lane reductions.
    inv_e = 1.0 / y.shape[-1]
    s1 = jnp.sum(y, axis=-1, keepdims=True)
    s2 = jnp.sum(y * y, axis=-1, keepdims=True)
    mean = s1 * inv_e
    var = jnp.maximum(s2 * inv_e - mean * mean, 0.0)

    yn = (y - mean) * jax.lax.rsqrt(var + LN_EPS)
    o_ref[...] = (yn * aux_ref[1:2, :] + aux_ref[2:3, :]).astype(o_ref.dtype)


@functools.partial(jax.jit, static_argnames=("patch_size",))
def patch_embedding(x, w, b, gamma, beta, *, patch_size):
    """x: (B, C, H, W) float32.  w: (E, C, p, p), b/gamma/beta: (E,)."""
    if x.ndim == 5:  # mirrors the torch `if len(x.shape) == 5: x = x.squeeze(-1)`
        x = jnp.squeeze(x, axis=-1)
    B, C, H, W = x.shape
    p = patch_size
    E = w.shape[0]
    Hp, Wp = H // p, W // p
    N = Hp * Wp
    K = C * p * p
    M = B * N

    # --- glue: patch extraction done in bf16 (halves the transpose HBM pass) ---
    # (B, C, Hp, p, Wp, p) -> (B, Hp, Wp, C, p, p) -> (B*N, K)
    # TODO(synk): if the producer can supply NHWC, this becomes a pure reshape
    # (the 6-D permute has no rectangular BlockSpec equivalent, so it stays in XLA).
    xb = x.astype(jnp.bfloat16)
    patches = xb.reshape(B, C, Hp, p, Wp, p)
    patches = patches.transpose(0, 2, 4, 1, 3, 5).reshape(M, K)

    # conv weight (E, C, p, p) -> (K, E), bf16 for the MXU.
    w2d = w.reshape(E, K).T.astype(jnp.bfloat16)

    # Merge bias / gamma / beta into one resident (3, E) f32 slab.
    aux = jnp.stack(
        [b.astype(jnp.float32), gamma.astype(jnp.float32), beta.astype(jnp.float32)],
        axis=0,
    )

    # --- padding ---
    # K: only round up to the bf16 sublane packing (16); the MXU pads the
    #    contraction internally, so padding all the way to 128 only inflates
    #    the streamed-patches HBM traffic.  (BlockSpec uses the full K dim, so
    #    the (8,128) divisibility rule is satisfied via "equals full dim".)
    # M: round up to the tile so the grid divides evenly; extra rows are zeros,
    #    LayerNorm treats them row-independently and they are sliced off.
    Kp = _round_up(K, 16)
    tm = min(512, _round_up(M, 8))          # big tile; multiple of 8 sublanes
    M_pad = _round_up(M, tm)
    if Kp != K or M_pad != M:
        patches = jnp.pad(patches, ((0, M_pad - M), (0, Kp - K)))
    if Kp != K:
        w2d = jnp.pad(w2d, ((0, Kp - K), (0, 0)))

    grid = (M_pad // tm,)

    out = pl.pallas_call(
        _patch_embed_kernel,
        out_shape=jax.ShapeDtypeStruct((M_pad, E), jnp.float32),
        grid_spec=pltpu.PrefetchScalarGridSpec(
            num_scalar_prefetch=0,
            grid=grid,
            in_specs=[
                pl.BlockSpec((tm, Kp), lambda i: (i, 0)),   # streaming patches
                pl.BlockSpec((Kp, E), lambda i: (0, 0)),    # resident weight
                pl.BlockSpec((3, E), lambda i: (0, 0)),     # resident b/gamma/beta
            ],
            out_specs=pl.BlockSpec((tm, E), lambda i: (i, 0)),
        ),
        compiler_params=pltpu.CompilerParams(
            dimension_semantics=("parallel",)),
    )(patches, w2d, aux)

    return out[:M].reshape(B, N, E)


def _reference(x, w, b, gamma, beta, patch_size):
    """Plain-JAX reference: bf16-input conv2d (stride=kernel=patch) + LayerNorm in f32."""
    y = jax.lax.conv_general_dilated(
        x.astype(jnp.bfloat16), w.astype(jnp.bfloat16),
        window_strides=(patch_size, patch_size), padding="VALID",
        dimension_numbers=("NCHW", "OIHW", "NCHW"),
        preferred_element_type=jnp.float32)
    y = y + b[None, :, None, None]
    B, E, Hp, Wp = y.shape
    y = y.transpose(0, 2, 3, 1).reshape(B, Hp * Wp, E)  # b (h w) e
    mean = jnp.mean(y, axis=-1, keepdims=True)
    var = jnp.mean(jnp.square(y - mean), axis=-1, keepdims=True)
    return (y - mean) * jax.lax.rsqrt(var + LN_EPS) * gamma + beta


if __name__ == "__main__":
    # small shapes consistent with the module's forward
    B, C, H, W = 2, 4, 16, 16
    patch_size = 2
    embed_dim = 128

    key = jax.random.PRNGKey(0)
    kx, kw, kb, kg, kbe = jax.random.split(key, 5)

    x = jax.random.normal(kx, (B, C, H, W), dtype=jnp.float32)
    w = jax.random.normal(kw, (embed_dim, C, patch_size, patch_size),
                          dtype=jnp.float32) * 0.05
    b = jax.random.normal(kb, (embed_dim,), dtype=jnp.float32) * 0.05
    gamma = jnp.ones((embed_dim,), dtype=jnp.float32) + \
        0.1 * jax.random.normal(kg, (embed_dim,), dtype=jnp.float32)
    beta = 0.1 * jax.random.normal(kbe, (embed_dim,), dtype=jnp.float32)

    out = patch_embedding(x, w, b, gamma, beta, patch_size=patch_size)
    out = jax.block_until_ready(out)

    ref = jax.block_until_ready(_reference(x, w, b, gamma, beta, patch_size))
    assert out.shape == (B, (H // patch_size) * (W // patch_size), embed_dim)
    assert jnp.allclose(out, ref, atol=1e-2, rtol=1e-2), \
        float(jnp.max(jnp.abs(out - ref)))

    print("KERNEL_OK")
</pallas_src>

<mosaic_0001>
module attributes {stable_mosaic.version = 11 : i64} {
  func.func @_patch_embed_kernel(%arg0: i32, %arg1: memref<128x16xbf16, #tpu.memory_space<vmem>>, %arg2: memref<16x128xbf16, #tpu.memory_space<vmem>>, %arg3: memref<3x128xf32, #tpu.memory_space<vmem>>, %arg4: memref<128x128xf32, #tpu.memory_space<vmem>>) attributes {dimension_semantics = [#tpu.dimension_semantics<parallel>], iteration_bounds = array<i64: 1>, scalar_prefetch = 0 : i64, scratch_operands = 0 : i64, tpu.core_type = #tpu.core_type<tc>, window_params = [{transform_indices = @transform_0, window_bounds = array<i64: 128, 16>}, {pipeline_mode = #tpu.pipeline_mode<synchronous>, transform_indices = @transform_1, window_bounds = array<i64: 16, 128>}, {pipeline_mode = #tpu.pipeline_mode<synchronous>, transform_indices = @transform_2, window_bounds = array<i64: 3, 128>}, {transform_indices = @transform_3, window_bounds = array<i64: 128, 128>}]} {
    %c0 = arith.constant 0 : index
    %c0_0 = arith.constant 0 : index
    %0 = vector.load %arg1[%c0, %c0_0] : memref<128x16xbf16, #tpu.memory_space<vmem>>, vector<128x16xbf16>
    %c0_1 = arith.constant 0 : index
    %c0_2 = arith.constant 0 : index
    %1 = vector.load %arg2[%c0_1, %c0_2] : memref<16x128xbf16, #tpu.memory_space<vmem>>, vector<16x128xbf16>
    %cst = arith.constant dense<0.000000e+00> : vector<128x128xf32>
    %2 = tpu.matmul %0, %1, %cst {dimension_numbers = #tpu.dot_dimension_numbers<[1], [0], [0], [1], [0, 0, 1, 1], [], []>} : vector<128x16xbf16>, vector<16x128xbf16>, vector<128x128xf32> -> vector<128x128xf32>
    %c0_3 = arith.constant 0 : index
    %c0_4 = arith.constant 0 : index
    %3 = vector.load %arg3[%c0_3, %c0_4] : memref<3x128xf32, #tpu.memory_space<vmem>>, vector<1x128xf32>
    %4 = vector.broadcast %3 : vector<1x128xf32> to vector<128x128xf32>
    %5 = arith.addf %2, %4 : vector<128x128xf32>
    %cst_5 = arith.constant dense<0.000000e+00> : vector<128xf32>
    %6 = vector.multi_reduction <add>, %5, %cst_5 [1] : vector<128x128xf32> to vector<128xf32>
    %7 = vector.shape_cast %6 : vector<128xf32> to vector<128x1xf32>
    %8 = arith.mulf %5, %5 : vector<128x128xf32>
    %cst_6 = arith.constant dense<0.000000e+00> : vector<128xf32>
    %9 = vector.multi_reduction <add>, %8, %cst_6 [1] : vector<128x128xf32> to vector<128xf32>
    %10 = vector.shape_cast %9 : vector<128xf32> to vector<128x1xf32>
    %cst_7 = arith.constant 7.812500e-03 : f32
    %11 = vector.broadcast %cst_7 : f32 to vector<128x1xf32>
    %12 = arith.mulf %7, %11 : vector<128x1xf32>
    %cst_8 = arith.constant 7.812500e-03 : f32
    %13 = vector.broadcast %cst_8 : f32 to vector<128x1xf32>
    %14 = arith.mulf %10, %13 : vector<128x1xf32>
    %15 = arith.mulf %12, %12 : vector<128x1xf32>
    %16 = arith.subf %14, %15 : vector<128x1xf32>
    %cst_9 = arith.constant 0.000000e+00 : f32
    %17 = vector.broadcast %cst_9 : f32 to vector<128x1xf32>
    %18 = arith.maximumf %16, %17 : vector<128x1xf32>
    %19 = vector.broadcast %12 : vector<128x1xf32> to vector<128x128xf32>
    %20 = arith.subf %5, %19 : vector<128x128xf32>
    %cst_10 = arith.constant 9.99999974E-6 : f32
    %21 = vector.broadcast %cst_10 : f32 to vector<128x1xf32>
    %22 = arith.addf %18, %21 : vector<128x1xf32>
    %23 = math.rsqrt %22 : vector<128x1xf32>
    %24 = vector.broadcast %23 : vector<128x1xf32> to vector<128x128xf32>
    %25 = arith.mulf %20, %24 : vector<128x128xf32>
    %c1 = arith.constant 1 : index
    %c0_11 = arith.constant 0 : index
    %26 = vector.load %arg3[%c1, %c0_11] : memref<3x128xf32, #tpu.memory_space<vmem>>, vector<1x128xf32>
    %27 = vector.broadcast %26 : vector<1x128xf32> to vector<128x128xf32>
    %28 = arith.mulf %25, %27 : vector<128x128xf32>
    %c2 = arith.constant 2 : index
    %c0_12 = arith.constant 0 : index
    %29 = vector.load %arg3[%c2, %c0_12] : memref<3x128xf32, #tpu.memory_space<vmem>>, vector<1x128xf32>
    %30 = vector.broadcast %29 : vector<1x128xf32> to vector<128x128xf32>
    %31 = arith.addf %28, %30 : vector<128x128xf32>
    %c0_13 = arith.constant 0 : index
    %c0_14 = arith.constant 0 : index
    %32 = vector.load %arg4[%c0_13, %c0_14] : memref<128x128xf32, #tpu.memory_space<vmem>>, vector<128x128xf32>
    tpu.vector_store %arg4[%c0_13, %c0_14], %31 {strides = array<i32>} : memref<128x128xf32, #tpu.memory_space<vmem>>, vector<128x128xf32>,
    return
  }
  func.func @transform_0(%arg0: i32) -> (i32, i32) {
    %c0_i32 = arith.constant 0 : i32
    %c0_i32_0 = arith.constant 0 : i32
    return %arg0, %c0_i32 : i32, i32
  }
  func.func @transform_1(%arg0: i32) -> (i32, i32) {
    %c0_i32 = arith.constant 0 : i32
    %c0_i32_0 = arith.constant 0 : i32
    %c0_i32_1 = arith.constant 0 : i32
    return %c0_i32, %c0_i32_0 : i32, i32
  }
  func.func @transform_2(%arg0: i32) -> (i32, i32) {
    %c0_i32 = arith.constant 0 : i32
    %c0_i32_0 = arith.constant 0 : i32
    %c0_i32_1 = arith.constant 0 : i32
    return %c0_i32, %c0_i32_0 : i32, i32
  }
  func.func @transform_3(%arg0: i32) -> (i32, i32) {
    %c0_i32 = arith.constant 0 : i32
    %c0_i32_0 = arith.constant 0 : i32
    return %arg0, %c0_i32 : i32, i32
  }
}

</mosaic_0001>

<bundles_post_ra>
// kernel: patch_embedding.1
= control target key start
LH: loop header
LB: loop body
LE: loop exit
PB: predicated region body
PF: predicated region fallthrough
CT: control target
= control target key end

     0   :  { %vm82_vm0 = vcmask 130048   ;;  %s1083_s0 = inlined_call_operand.vmem [shape: bf16[128,16], index: 0, kind: input, shape index: {}]   ;;  %s1084_s1 = inlined_call_operand.vmem [shape: bf16[16,128], index: 1, kind: input, shape index: {}]   ;;  %s1085_s2 = inlined_call_operand.vmem [shape: f32[3,128], index: 2, kind: input, shape index: {}]   ;;  %s1086_s3 = inlined_call_operand.hbm [shape: f32[128,128], index: 3, kind: output, shape index: {}]  }
   0x1   :  { %v646_v0 = vld [vmem:[%s1084_s1] sm:$0xff]  ;;  %v640_v2 = vld [vmem:[%s1083_s0 + $0x10] sm:$0xff] }
   0x2   :  { %v638_v1 = vld [vmem:[%s1083_s0] sm:$0xff]  ;;  %114 = vmatpush.bf16.msra.mxu0 %v646_v0  ;;  %647 = vmatpush.bf16.msra.mxu1 %v646_v0  ;;  %v644_v3 = vld [vmem:[%s1083_s0 + $0x30] sm:$0xff] }
   0x3   :  { %v642_v4 = vld [vmem:[%s1083_s0 + $0x20] sm:$0xff]  ;;  %649 = vmatpush.bf16.msra.mxu3 %v646_v0  ;;  %648 = vmatpush.bf16.msra.mxu2 %v646_v0 }
   0x4   :  { %8 = vsyncpa [#allocation3], 0  ;;  %v639_v5 = vld [vmem:[%s1083_s0 + $0x8] sm:$0xff]  ;;  %v641_v6 = vld [vmem:[%s1083_s0 + $0x18] sm:$0xff]  ;;  %s582_s10 = sshll.u32 %s1086_s3, 4  ;;  %s715_s11 = smov 128   ;;  %s583_s10 = int_to_ptr.hbm [resolvable:$true] %s582_s10 }
   0x5   :  { %630 = vmatmul.msk.bf16.vlgmr.msra.gmra.mxu0 %vm82_vm0, %v638_v1  ;;  %632 = vmatmul.msk.bf16.vlgmr.msra.gmra.mxu1 %vm82_vm0, %v640_v2  ;;  %v645_v7 = vld [vmem:[%s1083_s0 + $0x38] sm:$0xff]  ;;  %v643_v8 = vld [vmem:[%s1083_s0 + $0x28] sm:$0xff]  ;;  %v775_v9 = vld [vmem:[%s1085_s2] ss:$0 sm:$0xff]  ;;  %s716_s12 = smov 8  }
   0x6   :  { %636 = vmatmul.msk.bf16.vlgmr.msra.gmra.mxu3 %vm82_vm0, %v644_v3  ;;  %634 = vmatmul.msk.bf16.vlgmr.msra.gmra.mxu2 %vm82_vm0, %v642_v4 }
  0x15   :  { %631 = vmatmul.msk.bf16.gmra.mxu0 %vm82_vm0, %v639_v5  ;;  %633 = vmatmul.msk.bf16.gmra.mxu1 %vm82_vm0, %v641_v6 }
  0x16   :  { %637 = vmatmul.msk.bf16.gmra.mxu3 %vm82_vm0, %v645_v7  ;;  %635 = vmatmul.msk.bf16.gmra.mxu2 %vm82_vm0, %v643_v8 }
  0x82   :  { %v116_v10 = vpop.f32.mrf.mxu0  ;;  %v126_v11 = vpop.f32.mrf.mxu1 }
  0x83   :  { %v778_v12 = vadd.f32 %v775_v9, %v116_v10  ;;  %v781_v13 = vadd.f32 %v775_v9, %v126_v11 }
  0x85   :  { %164 = vadd.xlane.f32.xlu2 %v781_v13  ;;  %156 = vadd.xlane.f32.xlu0 %v778_v12  ;;  %v188_v14 = vmul.f32 %v778_v12, %v778_v12  ;;  %v192_v16 = vmul.f32 %v781_v13, %v781_v13 }
  0x87   :  { %204 = vadd.xlane.f32.xlu1 %v188_v14 }
  0x89   :  { %v146_v15 = vpop.f32.mrf.mxu3  ;;  %v136_v19 = vpop.f32.mrf.mxu2 }
  0x8a   :  { %v790_v17 = vadd.f32 %v775_v9, %v146_v15  ;;  %v118_v20 = vpop.f32.mrf.mxu0  ;;  %v796_v21 = vadd.f32 %v775_v9, %v136_v19  ;;  %v128_v25 = vpop.f32.mrf.mxu1 }
  0x8b   :  { %v799_v23 = vadd.f32 %v775_v9, %v118_v20  ;;  %v810_v28 = vadd.f32 %v775_v9, %v128_v25 }
  0x8c   :  { %v200_v18 = vmul.f32 %v790_v17, %v790_v17  ;;  %v196_v26 = vmul.f32 %v796_v21, %v796_v21 }
  0x8d   :  { %212 = vadd.xlane.f32.xlu2 %v192_v16  ;;  %180 = vadd.xlane.f32.xlu0 %v790_v17  ;;  %v189_v32 = vmul.f32 %v799_v23, %v799_v23  ;;  %v193_v33 = vmul.f32 %v810_v28, %v810_v28 }
  0x8f   :  { %228 = vadd.xlane.f32.xlu1 %v200_v18 }
  0x91   :  { %v148_v22 = vpop.f32.mrf.mxu3  ;;  %v138_v30 = vpop.f32.mrf.mxu2 }
  0x92   :  { %v802_v24 = vadd.f32 %v775_v9, %v148_v22  ;;  %v121_v27 = vpop.f32.mrf.mxu0  ;;  %v818_v31 = vadd.f32 %v775_v9, %v138_v30  ;;  %v131_v35 = vpop.f32.mrf.mxu1 }
  0x93   :  { %v813_v29 = vadd.f32 %v775_v9, %v121_v27  ;;  %v827_v37 = vadd.f32 %v775_v9, %v131_v35 }
  0x94   :  { %v197_v34 = vmul.f32 %v818_v31, %v818_v31  ;;  %v201_v53 = vmul.f32 %v802_v24, %v802_v24 }
  0x95   :  { %172 = vadd.xlane.f32.xlu2 %v796_v21  ;;  %158 = vadd.xlane.f32.xlu0 %v799_v23  ;;  %v194_v39 = vmul.f32 %v827_v37, %v827_v37  ;;  %v190_v47 = vmul.f32 %v813_v29, %v813_v29 }
  0x97   :  { %182 = vadd.xlane.f32.xlu1 %v802_v24 }
  0x99   :  { %v151_v36 = vpop.f32.mrf.mxu3  ;;  %v141_v40 = vpop.f32.mrf.mxu2 }
  0x9a   :  { %v830_v38 = vadd.f32 %v775_v9, %v151_v36  ;;  %v835_v41 = vadd.f32 %v775_v9, %v141_v40  ;;  %v133_v43 = vpop.f32.mrf.mxu1  ;;  %v123_v45 = vpop.f32.mrf.mxu0 }
  0x9b   :  { %v843_v44 = vadd.f32 %v775_v9, %v133_v43  ;;  %v851_v48 = vadd.f32 %v775_v9, %v123_v45 }
  0x9c   :  { %v198_v42 = vmul.f32 %v835_v41, %v835_v41  ;;  %v202_v56 = vmul.f32 %v830_v38, %v830_v38 }
  0x9d   :  { %166 = vadd.xlane.f32.xlu2 %v810_v28  ;;  %220 = vadd.xlane.f32.xlu0 %v196_v26  ;;  %v195_v46 = vmul.f32 %v843_v44, %v843_v44  ;;  %v191_v55 = vmul.f32 %v851_v48, %v851_v48 }
  0x9f   :  { %160 = vadd.xlane.f32.xlu1 %v813_v29 }
  0xa1   :  { %v143_v49 = vpop.f32.mrf.mxu2  ;;  %v153_v50 = vpop.f32.mrf.mxu3 }
  0xa2   :  { %v855_v51 = vadd.f32 %v775_v9, %v143_v49  ;;  %v858_v52 = vadd.f32 %v775_v9, %v153_v50 }
  0xa4   :  { %v199_v54 = vmul.f32 %v855_v51, %v855_v51  ;;  %v203_v57 = vmul.f32 %v858_v52, %v858_v52 }
  0xa5   :  { %206 = vadd.xlane.f32.xlu2 %v189_v32  ;;  %214 = vadd.xlane.f32.xlu0 %v193_v33 }
  0xa7   :  { %222 = vadd.xlane.f32.xlu1 %v197_v34 }
  0xad   :  { %184 = vadd.xlane.f32.xlu2 %v830_v38  ;;  %174 = vadd.xlane.f32.xlu0 %v818_v31 }
  0xaf   :  { %216 = vadd.xlane.f32.xlu1 %v194_v39 }
  0xb5   :  { %224 = vadd.xlane.f32.xlu2 %v198_v42  ;;  %168 = vadd.xlane.f32.xlu0 %v827_v37 }
  0xb7   :  { %176 = vadd.xlane.f32.xlu1 %v835_v41 }
  0xbd   :  { %218 = vadd.xlane.f32.xlu2 %v195_v46  ;;  %208 = vadd.xlane.f32.xlu0 %v190_v47 }
  0xbf   :  { %162 = vadd.xlane.f32.xlu1 %v851_v48 }
  0xc5   :  { %178 = vadd.xlane.f32.xlu2 %v855_v51  ;;  %186 = vadd.xlane.f32.xlu0 %v858_v52 }
  0xc7   :  { %170 = vadd.xlane.f32.xlu1 %v843_v44 }
  0xcd   :  { %230 = vadd.xlane.f32.xlu2 %v201_v53  ;;  %226 = vadd.xlane.f32.xlu0 %v199_v54 }
  0xcf   :  { %210 = vadd.xlane.f32.xlu1 %v191_v55 }
  0xd5   :  { %232 = vadd.xlane.f32.xlu0 %v202_v56 }
  0xd7   :  { %234 = vadd.xlane.f32.xlu1 %v203_v57  ;;  %v895_v57 = vld [vmem:[%s1085_s2 + $0x1] ss:$0 sm:$0xff] }
  0xf8   :  { %v165_v58 = vpop.xlane.xlu2 %164  ;;  %v157_v59 = vpop.xlane.xlu0 %156 }
  0xf9   :  { %v236_v60 = vmul.f32 0.0078125, %v157_v59  ;;  %v873_v0 = vmul.f32 0.0078125, %v165_v58 }
  0xfa   :  { %v205_v61 = vpop.xlane.xlu1 %204 }
  0xfb   :  { %v268_v62 = vmul.f32 %v236_v60, %v236_v60  ;;  %v252_v63 = vmul.f32 0.0078125, %v205_v61  ;;  %v272_v2 = vmul.f32 %v873_v0, %v873_v0  ;;  %v316_v56 = vsub.f32 %v778_v12, %v236_v60 }
  0xfc   :  { %v320_v60 = vsub.f32 %v781_v13, %v873_v0 }
  0xfd   :  { %v284_v1 = vsub.f32 %v252_v63, %v268_v62 }
  0xff   :  { %v300_v3 = vmax.f32 %v284_v1, 0.0  ;;  %v902_v1 = vld [vmem:[%s1085_s2 + $0x2] ss:$0 sm:$0xff]  ;;  %s714_s2 = smov [#allocation2]  }
 0x100   :  { %v213_v4 = vpop.xlane.xlu2 %212  ;;  %v181_v5 = vpop.xlane.xlu0 %180  ;;  %s580_s7 = sshll.u32 %s714_s2, 4  ;;  %s581_s7 = int_to_ptr.vmem [resolvable:$true] %s580_s7 }
 0x101   :  { %v256_v6 = vmul.f32 0.0078125, %v213_v4  ;;  %v877_v7 = vmul.f32 0.0078125, %v181_v5  ;;  %v332_v8 = vadd.f32 1e-05, %v300_v3 }
 0x102   :  { %v229_v9 = vpop.xlane.xlu1 %228 }
 0x103   :  { %v288_v10 = vsub.f32 %v256_v6, %v272_v2  ;;  %v280_v11 = vmul.f32 %v877_v7, %v877_v7  ;;  %v264_v14 = vmul.f32 0.0078125, %v229_v9  ;;  %656 = vrsqrt.f32 %v332_v8 }
 0x104   :  { %vm354_vm2 = vweird.f32 %v332_v8 }
 0x105   :  { %v304_v15 = vmax.f32 %v288_v10, 0.0  ;;  %v296_v16 = vsub.f32 %v264_v14, %v280_v11 }
 0x107   :  { %v336_v18 = vadd.f32 1e-05, %v304_v15  ;;  %v312_v19 = vmax.f32 %v296_v16, 0.0 }
 0x108   :  { %v173_v20 = vpop.xlane.xlu2 %172  ;;  %v159_v22 = vpop.xlane.xlu0 %158 }
 0x109   :  { %658 = vrsqrt.f32 %v336_v18  ;;  %v344_v25 = vadd.f32 1e-05, %v312_v19  ;;  %v657_v26 = vpop.eup %656  ;;  %v883_v33 = vmul.f32 0.0078125, %v173_v20  ;;  %v889_v54 = vmul.f32 0.0078125, %v159_v22 }
 0x10a   :  { %v881_v27 = vpop.xlane.xlu1 %182  ;;  %v349_v30 = vmul.f32 %v657_v26, %v332_v8  ;;  %vm355_vm1 = vweird.f32 %v657_v26  ;;  %vm394_vm5 = vweird.f32 %v336_v18  ;;  %v328_v22 = vsub.f32 %v790_v17, %v877_v7 }
 0x10b   :  { %660 = vrsqrt.f32 %v344_v25  ;;  %v276_v36 = vmul.f32 %v883_v33, %v883_v33  ;;  %vm356_vm3 = vmor %vm354_vm2, %vm355_vm1  ;;  %v269_v4 = vmul.f32 %v889_v54, %v889_v54  ;;  %vm474_vm8 = vweird.f32 %v344_v25 }
 0x10c   :  { %v350_v32 = vmul.f32 %v657_v26, %v349_v30 }
 0x10e   :  { %v351_v35 = vmul.f32 0.5, %v350_v32 }
 0x10f   :  { %v659_v34 = vpop.eup %658 }
 0x110   :  { %v389_v39 = vmul.f32 %v659_v34, %v336_v18  ;;  %v167_v40 = vpop.xlane.xlu2 %166  ;;  %v221_v42 = vpop.xlane.xlu0 %220  ;;  %v352_v45 = vsub.f32 1.5, %v351_v35  ;;  %vm395_vm4 = vweird.f32 %v659_v34 }
 0x111   :  { %v661_v43 = vpop.eup %660  ;;  %v260_v46 = vmul.f32 0.0078125, %v221_v42  ;;  %v897_v62 = vmul.f32 0.0078125, %v167_v40  ;;  %vm396_vm7 = vmor %vm394_vm5, %vm395_vm4 }
 0x112   :  { %v390_v47 = vmul.f32 %v659_v34, %v389_v39  ;;  %v469_v49 = vmul.f32 %v661_v43, %v344_v25  ;;  %v887_v50 = vpop.xlane.xlu1 %160  ;;  %v353_v53 = vmul.f32 %v657_v26, %v352_v45  ;;  %vm475_vm6 = vweird.f32 %v661_v43 }
 0x113   :  { %v292_v55 = vsub.f32 %v260_v46, %v276_v36  ;;  %v273_v14 = vmul.f32 %v897_v62, %v897_v62  ;;  %vm476_vm9 = vmor %vm474_vm8, %vm475_vm6 }
 0x114   :  { %v391_v58 = vmul.f32 0.5, %v390_v47  ;;  %v470_v59 = vmul.f32 %v661_v43, %v469_v49  ;;  %v357_v61 = vsel %vm356_vm3, %v657_v26, %v353_v53 }
 0x115   :  { %v308_v63 = vmax.f32 %v292_v55, 0.0  ;;  %v508_v2 = vmul.f32 %v357_v61, %v316_v56 }
 0x116   :  { %v392_v3 = vsub.f32 1.5, %v391_v58  ;;  %v471_v12 = vmul.f32 0.5, %v470_v59 }
 0x117   :  { %v340_v5 = vadd.f32 1e-05, %v308_v63  ;;  %v526_v6 = vmul.f32 %v895_v57, %v508_v2 }
 0x118   :  { %v393_v8 = vmul.f32 %v659_v34, %v392_v3  ;;  %v472_v9 = vsub.f32 1.5, %v471_v12  ;;  %v207_v10 = vpop.xlane.xlu2 %206  ;;  %v215_v11 = vpop.xlane.xlu0 %214 }
 0x119   :  { %662 = vrsqrt.f32 %v340_v5  ;;  %v253_v15 = vmul.f32 0.0078125, %v207_v10  ;;  %v257_v16 = vmul.f32 0.0078125, %v215_v11  ;;  %v544_v13 = vadd.f32 %v902_v1, %v526_v6 }
 0x11a   :  { %v397_v0 = vsel %vm396_vm7, %v659_v34, %v393_v8  ;;  %v473_v18 = vmul.f32 %v661_v43, %v472_v9  ;;  %v223_v19 = vpop.xlane.xlu1 %222  ;;  %vm434_vm11 = vweird.f32 %v340_v5  ;;  %v324_v9 = vsub.f32 %v796_v21, %v883_v33 }
 0x11b   :  { %v512_v20 = vmul.f32 %v397_v0, %v320_v60  ;;  %v285_v26 = vsub.f32 %v253_v15, %v269_v4  ;;  %v289_v30 = vsub.f32 %v257_v16, %v273_v14  ;;  %560 = vst [vmem:[#allocation2] sm:$0xff] %v544_v13  ;;  %v261_v58 = vmul.f32 0.0078125, %v223_v19 }
 0x11c   :  { %v477_v32 = vsel %vm476_vm9, %v661_v43, %v473_v18 }
 0x11d   :  { %v530_v35 = vmul.f32 %v895_v57, %v512_v20  ;;  %v520_v36 = vmul.f32 %v477_v32, %v328_v22  ;;  %v301_v39 = vmax.f32 %v285_v26, 0.0  ;;  %v305_v40 = vmax.f32 %v289_v30, 0.0 }
 0x11e   :  { %v942_v32 = vmul.f32 0.0078125, %v887_v50 }
 0x11f   :  { %v663_v42 = vpop.eup %662  ;;  %v548_v34 = vadd.f32 %v902_v1, %v530_v35  ;;  %v538_v25 = vmul.f32 %v895_v57, %v520_v36  ;;  %v333_v45 = vadd.f32 1e-05, %v301_v39  ;;  %v918_v46 = vadd.f32 1e-05, %v305_v40 }
 0x120   :  { %v429_v17 = vmul.f32 %v663_v42, %v340_v5  ;;  %v920_v7 = vpop.xlane.xlu2 %184  ;;  %v175_v47 = vpop.xlane.xlu0 %174  ;;  %vm435_vm10 = vweird.f32 %v663_v42 }
 0x121   :  { %564 = vst [vmem:[#allocation2 + $0x20] sm:$0xff] %v548_v34  ;;  %v556_v43 = vadd.f32 %v902_v1, %v538_v25  ;;  %664 = vrsqrt.f32 %v333_v45  ;;  %v924_v53 = vmul.f32 0.0078125, %v175_v47  ;;  %vm436_vm12 = vmor %vm434_vm11, %vm435_vm10  ;;  %v317_v34 = vsub.f32 %v799_v23, %v889_v54 }
 0x122   :  { %v430_v49 = vmul.f32 %v663_v42, %v429_v17  ;;  %666 = vrsqrt.f32 %v918_v46  ;;  %v217_v55 = vpop.xlane.xlu1 %216  ;;  %vm364_vm15 = vweird.f32 %v333_v45  ;;  %vm404_vm1 = vweird.f32 %v918_v46 }
 0x123   :  { %572 = vst [vmem:[#allocation2 + $0x60] sm:$0xff] %v556_v43  ;;  %v277_v59 = vmul.f32 %v924_v53, %v924_v53  ;;  %v258_v5 = vmul.f32 0.0078125, %v217_v55 }
 0x124   :  { %v431_v56 = vmul.f32 0.5, %v430_v49 }
 0x125   :  { %v293_v63 = vsub.f32 %v261_v58, %v277_v59  ;;  %v321_v58 = vsub.f32 %v810_v28, %v897_v62 }
 0x126   :  { %v432_v61 = vsub.f32 1.5, %v431_v56 }
 0x127   :  { %v665_v2 = vpop.eup %664  ;;  %v309_v4 = vmax.f32 %v293_v63, 0.0 }
 0x128   :  { %v667_v3 = vpop.eup %666  ;;  %v433_v12 = vmul.f32 %v663_v42, %v432_v61  ;;  %v359_v60 = vmul.f32 %v665_v2, %v333_v45  ;;  %v225_v6 = vpop.xlane.xlu2 %224  ;;  %vm365_vm13 = vweird.f32 %v665_v2  ;;  %v270_v45 = vmul.f32 %v942_v32, %v942_v32 }
 0x129   :  { %v169_v8 = vpop.xlane.xlu0 %168  ;;  %v399_v10 = vmul.f32 %v667_v3, %v918_v46  ;;  %v933_v16 = vadd.f32 1e-05, %v309_v4  ;;  %v262_v21 = vmul.f32 0.0078125, %v225_v6  ;;  %vm405_vm14 = vweird.f32 %v667_v3  ;;  %vm366_vm0 = vmor %vm364_vm15, %vm365_vm13 }
 0x12a   :  { %v931_v11 = vmul.f32 0.0078125, %v169_v8  ;;  %v437_v14 = vsel %vm436_vm12, %v663_v42, %v433_v12  ;;  %v360_v15 = vmul.f32 %v665_v2, %v359_v60  ;;  %v177_v13 = vpop.xlane.xlu1 %176  ;;  %vm406_vm2 = vmor %vm404_vm1, %vm405_vm14 }
 0x12b   :  { %v516_v0 = vmul.f32 %v437_v14, %v324_v9  ;;  %v400_v18 = vmul.f32 %v667_v3, %v399_v10  ;;  %668 = vrsqrt.f32 %v933_v16  ;;  %v938_v33 = vmul.f32 0.0078125, %v177_v13 }
 0x12c   :  { %v274_v19 = vmul.f32 %v931_v11, %v931_v11  ;;  %v361_v20 = vmul.f32 0.5, %v360_v15  ;;  %vm444_vm4 = vweird.f32 %v933_v16 }
 0x12d   :  { %v534_v22 = vmul.f32 %v895_v57, %v516_v0  ;;  %v401_v26 = vmul.f32 0.5, %v400_v18  ;;  %v278_v36 = vmul.f32 %v938_v33, %v938_v33 }
 0x12e   :  { %v290_v30 = vsub.f32 %v258_v5, %v274_v19  ;;  %v362_v35 = vsub.f32 1.5, %v361_v20 }
 0x12f   :  { %v552_v39 = vadd.f32 %v902_v1, %v534_v22  ;;  %v402_v40 = vsub.f32 1.5, %v401_v26  ;;  %v294_v17 = vsub.f32 %v262_v21, %v278_v36  ;;  %v325_v26 = vsub.f32 %v818_v31, %v924_v53 }
 0x130   :  { %v306_v42 = vmax.f32 %v290_v30, 0.0  ;;  %v363_v25 = vmul.f32 %v665_v2, %v362_v35  ;;  %v219_v47 = vpop.xlane.xlu2 %218  ;;  %v322_v30 = vsub.f32 %v827_v37, %v931_v11 }
 0x131   :  { %v209_v43 = vpop.xlane.xlu0 %208  ;;  %568 = vst [vmem:[#allocation2 + $0x40] sm:$0xff] %v552_v39  ;;  %v403_v50 = vmul.f32 %v667_v3, %v402_v40  ;;  %v669_v56 = vpop.eup %668  ;;  %v310_v23 = vmax.f32 %v294_v17, 0.0  ;;  %v326_v39 = vsub.f32 %v835_v41, %v938_v33 }
 0x132   :  { %v950_v49 = vadd.f32 1e-05, %v306_v42  ;;  %v254_v55 = vmul.f32 0.0078125, %v209_v43  ;;  %v367_v59 = vsel %vm366_vm0, %v665_v2, %v363_v25  ;;  %v163_v54 = vpop.xlane.xlu1 %162  ;;  %v439_v12 = vmul.f32 %v669_v56, %v933_v16 }
 0x133   :  { %v509_v61 = vmul.f32 %v367_v59, %v317_v34  ;;  %v407_v63 = vsel %vm406_vm2, %v667_v3, %v403_v50  ;;  %v959_v60 = vadd.f32 1e-05, %v310_v23  ;;  %v966_v3 = vmul.f32 0.0078125, %v881_v27 }
 0x134   :  { %v513_v46 = vmul.f32 %v407_v63, %v321_v58  ;;  %670 = vrsqrt.f32 %v950_v49  ;;  %v440_v28 = vmul.f32 %v669_v56, %v439_v12  ;;  %v286_v62 = vsub.f32 %v254_v55, %v270_v45 }
 0x135   :  { %v527_v4 = vmul.f32 %v895_v57, %v509_v61  ;;  %672 = vrsqrt.f32 %v959_v60  ;;  %vm445_vm3 = vweird.f32 %v669_v56  ;;  %v974_v27 = vmul.f32 0.0078125, %v163_v54 }
 0x136   :  { %v531_v2 = vmul.f32 %v895_v57, %v513_v46  ;;  %v441_v8 = vmul.f32 0.5, %v440_v28  ;;  %v302_v9 = vmax.f32 %v286_v62, 0.0  ;;  %v281_v22 = vmul.f32 %v966_v3, %v966_v3  ;;  %vm446_vm5 = vmor %vm444_vm4, %vm445_vm3 }
 0x137   :  { %v545_v6 = vadd.f32 %v902_v1, %v527_v4  ;;  %vm414_vm6 = vweird.f32 %v950_v49  ;;  %v259_v34 = vmul.f32 0.0078125, %v219_v47  ;;  %vm454_vm7 = vweird.f32 %v959_v60 }
 0x138   :  { %v549_v10 = vadd.f32 %v902_v1, %v531_v2  ;;  %v179_v14 = vpop.xlane.xlu2 %178  ;;  %v442_v13 = vsub.f32 1.5, %v441_v8  ;;  %v969_v0 = vadd.f32 1e-05, %v302_v9  ;;  %v271_v37 = vmul.f32 %v974_v27, %v974_v27 }
 0x139   :  { %v187_v15 = vpop.xlane.xlu0 %186  ;;  %561 = vst [vmem:[#allocation2 + $0x8] sm:$0xff] %v545_v6  ;;  %v982_v16 = vmul.f32 0.0078125, %v179_v14 }
 0x13a   :  { %v671_v18 = vpop.eup %670  ;;  %565 = vst [vmem:[#allocation2 + $0x28] sm:$0xff] %v549_v10  ;;  %v171_v5 = vpop.xlane.xlu1 %170  ;;  %v443_v19 = vmul.f32 %v669_v56, %v442_v13  ;;  %674 = vrsqrt.f32 %v969_v0  ;;  %v1003_v28 = vmul.f32 0.0078125, %v187_v15  ;;  %vm374_vm13 = vweird.f32 %v969_v0 }
 0x13b   :  { %v409_v20 = vmul.f32 %v671_v18, %v950_v49  ;;  %v673_v21 = vpop.eup %672  ;;  %v988_v25 = vmul.f32 0.0078125, %v171_v5  ;;  %vm415_vm8 = vweird.f32 %v671_v18  ;;  %v279_v41 = vmul.f32 %v982_v16, %v982_v16 }
 0x13c   :  { %v447_v35 = vsel %vm446_vm5, %v669_v56, %v443_v19  ;;  %v449_v40 = vmul.f32 %v673_v21, %v959_v60  ;;  %vm455_vm9 = vweird.f32 %v673_v21  ;;  %vm416_vm10 = vmor %vm414_vm6, %vm415_vm8  ;;  %v318_v60 = vsub.f32 %v813_v29, %v942_v32 }
 0x13d   :  { %v410_v36 = vmul.f32 %v671_v18, %v409_v20  ;;  %v517_v42 = vmul.f32 %v447_v35, %v325_v26  ;;  %v275_v33 = vmul.f32 %v988_v25, %v988_v25  ;;  %vm456_vm11 = vmor %vm454_vm7, %vm455_vm9  ;;  %v1019_v35 = vmul.f32 0.0078125, %v920_v7 }
 0x13e   :  { %v450_v53 = vmul.f32 %v673_v21, %v449_v40 }
 0x13f   :  { %v411_v31 = vmul.f32 0.5, %v410_v36  ;;  %v535_v11 = vmul.f32 %v895_v57, %v517_v42  ;;  %v291_v54 = vsub.f32 %v259_v34, %v275_v33  ;;  %v282_v42 = vmul.f32 %v1019_v35, %v1019_v35 }
 0x140   :  { %v231_v17 = vpop.xlane.xlu2 %230  ;;  %v675_v43 = vpop.eup %674  ;;  %v451_v55 = vmul.f32 0.5, %v450_v53 }
 0x141   :  { %v227_v47 = vpop.xlane.xlu0 %226  ;;  %v412_v50 = vsub.f32 1.5, %v411_v31  ;;  %v265_v56 = vmul.f32 0.0078125, %v231_v17  ;;  %v553_v59 = vadd.f32 %v902_v1, %v535_v11  ;;  %v369_v23 = vmul.f32 %v675_v43, %v969_v0 }
 0x142   :  { %v263_v58 = vmul.f32 0.0078125, %v227_v47  ;;  %v211_v45 = vpop.xlane.xlu1 %210  ;;  %v452_v63 = vsub.f32 1.5, %v451_v55  ;;  %v307_v62 = vmax.f32 %v291_v54, 0.0  ;;  %vm375_vm12 = vweird.f32 %v675_v43 }
 0x143   :  { %v413_v61 = vmul.f32 %v671_v18, %v412_v50  ;;  %v297_v12 = vsub.f32 %v265_v56, %v281_v22  ;;  %569 = vst [vmem:[#allocation2 + $0x48] sm:$0xff] %v553_v59  ;;  %v370_v4 = vmul.f32 %v675_v43, %v369_v23  ;;  %v255_v2 = vmul.f32 0.0078125, %v211_v45  ;;  %vm376_vm14 = vmor %vm374_vm13, %vm375_vm12 }
 0x144   :  { %v295_v46 = vsub.f32 %v263_v58, %v279_v41  ;;  %v453_v8 = vmul.f32 %v673_v21, %v452_v63  ;;  %v1008_v5 = vadd.f32 1e-05, %v307_v62  ;;  %v283_v31 = vmul.f32 %v1003_v28, %v1003_v28 }
 0x145   :  { %v417_v6 = vsel %vm416_vm10, %v671_v18, %v413_v61  ;;  %v313_v9 = vmax.f32 %v297_v12, 0.0  ;;  %v371_v13 = vmul.f32 0.5, %v370_v4  ;;  %v287_v20 = vsub.f32 %v255_v2, %v271_v37 }
 0x146   :  { %v311_v10 = vmax.f32 %v295_v46, 0.0  ;;  %v514_v14 = vmul.f32 %v417_v6, %v322_v30  ;;  %v457_v49 = vsel %vm456_vm11, %v673_v21, %v453_v8  ;;  %676 = vrsqrt.f32 %v1008_v5 }
 0x147   :  { %v1010_v19 = vadd.f32 1e-05, %v313_v9  ;;  %v518_v22 = vmul.f32 %v457_v49, %v326_v39  ;;  %v372_v26 = vsub.f32 1.5, %v371_v13  ;;  %v303_v29 = vmax.f32 %v287_v20, 0.0 }
 0x148   :  { %v1012_v15 = vadd.f32 1e-05, %v311_v10  ;;  %v532_v18 = vmul.f32 %v895_v57, %v514_v14  ;;  %vm424_vm1 = vweird.f32 %v1008_v5  ;;  %v323_v13 = vsub.f32 %v843_v44, %v988_v25 }
 0x149   :  { %v233_v30 = vpop.xlane.xlu0 %232  ;;  %678 = vrsqrt.f32 %v1010_v19  ;;  %v536_v36 = vmul.f32 %v895_v57, %v518_v22  ;;  %v373_v40 = vmul.f32 %v675_v43, %v372_v26  ;;  %v1032_v37 = vadd.f32 1e-05, %v303_v29 }
 0x14a   :  { %v550_v21 = vadd.f32 %v902_v1, %v532_v18  ;;  %680 = vrsqrt.f32 %v1012_v15  ;;  %v235_v39 = vpop.xlane.xlu1 %234  ;;  %v266_v7 = vmul.f32 0.0078125, %v233_v30  ;;  %vm484_vm4 = vweird.f32 %v1010_v19 }
 0x14b   :  { %v267_v32 = vmul.f32 0.0078125, %v235_v39  ;;  %v554_v0 = vadd.f32 %v902_v1, %v536_v36  ;;  %v377_v34 = vsel %vm376_vm14, %v675_v43, %v373_v40  ;;  %682 = vrsqrt.f32 %v1032_v37 }
 0x14c   :  { %566 = vst [vmem:[#allocation2 + $0x30] sm:$0xff] %v550_v21  ;;  %v510_v53 = vmul.f32 %v377_v34, %v318_v60  ;;  %v298_v11 = vsub.f32 %v266_v7, %v282_v42  ;;  %v677_v41 = vpop.eup %676  ;;  %v329_v18 = vsub.f32 %v802_v24, %v966_v3  ;;  %vm464_vm6 = vweird.f32 %v1012_v15 }
 0x14d   :  { %570 = vst [vmem:[#allocation2 + $0x50] sm:$0xff] %v554_v0  ;;  %v299_v33 = vsub.f32 %v267_v32, %v283_v31  ;;  %v419_v50 = vmul.f32 %v677_v41, %v1008_v5  ;;  %vm425_vm15 = vweird.f32 %v677_v41  ;;  %v327_v5 = vsub.f32 %v855_v51, %v982_v16 }
 0x14e   :  { %v528_v47 = vmul.f32 %v895_v57, %v510_v53  ;;  %v314_v56 = vmax.f32 %v298_v11, 0.0  ;;  %vm426_vm3 = vmor %vm424_vm1, %vm425_vm15  ;;  %vm384_vm9 = vweird.f32 %v1032_v37  ;;  %v319_v32 = vsub.f32 %v851_v48, %v974_v27 }
 0x14f   :  { %v679_v17 = vpop.eup %678  ;;  %v420_v59 = vmul.f32 %v677_v41, %v419_v50  ;;  %v315_v61 = vmax.f32 %v299_v33, 0.0 }
 0x150   :  { %v681_v55 = vpop.eup %680  ;;  %v479_v43 = vmul.f32 %v679_v17, %v1010_v19  ;;  %v546_v58 = vadd.f32 %v902_v1, %v528_v47  ;;  %v1040_v45 = vadd.f32 1e-05, %v314_v56  ;;  %vm485_vm0 = vweird.f32 %v679_v17 }
 0x151   :  { %v459_v23 = vmul.f32 %v681_v55, %v1012_v15  ;;  %v421_v63 = vmul.f32 0.5, %v420_v59  ;;  %v1043_v4 = vadd.f32 1e-05, %v315_v61  ;;  %v683_v62 = vpop.eup %682  ;;  %vm465_vm2 = vweird.f32 %v681_v55  ;;  %vm486_vm5 = vmor %vm484_vm4, %vm485_vm0 }
 0x152   :  { %v480_v54 = vmul.f32 %v679_v17, %v479_v43  ;;  %562 = vst [vmem:[#allocation2 + $0x10] sm:$0xff] %v546_v58  ;;  %684 = vrsqrt.f32 %v1040_v45  ;;  %v379_v9 = vmul.f32 %v683_v62, %v1032_v37  ;;  %vm466_vm7 = vmor %vm464_vm6, %vm465_vm2  ;;  %vm385_vm8 = vweird.f32 %v683_v62 }
 0x153   :  { %v460_v12 = vmul.f32 %v681_v55, %v459_v23  ;;  %v422_v2 = vsub.f32 1.5, %v421_v63  ;;  %686 = vrsqrt.f32 %v1043_v4  ;;  %vm386_vm10 = vmor %vm384_vm9, %vm385_vm8  ;;  %vm494_vm12 = vweird.f32 %v1040_v45 }
 0x154   :  { %v481_v46 = vmul.f32 0.5, %v480_v54  ;;  %v380_v20 = vmul.f32 %v683_v62, %v379_v9  ;;  %v330_v47 = vsub.f32 %v830_v38, %v1019_v35  ;;  %vm504_vm15 = vweird.f32 %v1043_v4 }
 0x155   :  { %v461_v6 = vmul.f32 0.5, %v460_v12  ;;  %v423_v10 = vmul.f32 %v677_v41, %v422_v2  ;;  %v331_v56 = vsub.f32 %v858_v52, %v1003_v28 }
 0x156   :  { %v482_v8 = vsub.f32 1.5, %v481_v46  ;;  %v381_v44 = vmul.f32 0.5, %v380_v20 }
 0x157   :  { %v462_v14 = vsub.f32 1.5, %v461_v6  ;;  %v427_v22 = vsel %vm426_vm3, %v677_v41, %v423_v10 }
 0x158   :  { %v483_v49 = vmul.f32 %v679_v17, %v482_v8  ;;  %v685_v30 = vpop.eup %684  ;;  %v515_v60 = vmul.f32 %v427_v22, %v323_v13  ;;  %v382_v39 = vsub.f32 1.5, %v381_v44 }
 0x159   :  { %v463_v26 = vmul.f32 %v681_v55, %v462_v14  ;;  %v489_v36 = vmul.f32 %v685_v30, %v1040_v45  ;;  %v687_v40 = vpop.eup %686  ;;  %vm495_vm11 = vweird.f32 %v685_v30 }
 0x15a   :  { %v487_v21 = vsel %vm486_vm5, %v679_v17, %v483_v49  ;;  %v533_v24 = vmul.f32 %v895_v57, %v515_v60  ;;  %v499_v51 = vmul.f32 %v687_v40, %v1043_v4  ;;  %v383_v7 = vmul.f32 %v683_v62, %v382_v39  ;;  %vm496_vm14 = vmor %vm494_vm12, %vm495_vm11 }
 0x15b   :  { %v521_v25 = vmul.f32 %v487_v21, %v329_v18  ;;  %v467_v19 = vsel %vm466_vm7, %v681_v55, %v463_v26  ;;  %v490_v42 = vmul.f32 %v685_v30, %v489_v36  ;;  %vm505_vm13 = vweird.f32 %v687_v40 }
 0x15c   :  { %v519_v3 = vmul.f32 %v467_v19, %v327_v5  ;;  %v551_v16 = vadd.f32 %v902_v1, %v533_v24  ;;  %v500_v31 = vmul.f32 %v687_v40, %v499_v51  ;;  %v387_v11 = vsel %vm386_vm10, %v683_v62, %v383_v7  ;;  %vm506_vm0 = vmor %vm504_vm15, %vm505_vm13 }
 0x15d   :  { %v539_v15 = vmul.f32 %v895_v57, %v521_v25  ;;  %v491_v34 = vmul.f32 0.5, %v490_v42  ;;  %v511_v41 = vmul.f32 %v387_v11, %v319_v32 }
 0x15e   :  { %v537_v29 = vmul.f32 %v895_v57, %v519_v3  ;;  %567 = vst [vmem:[#allocation2 + $0x38] sm:$0xff] %v551_v16  ;;  %v501_v17 = vmul.f32 0.5, %v500_v31 }
 0x15f   :  { %v557_v0 = vadd.f32 %v902_v1, %v539_v15  ;;  %v492_v33 = vsub.f32 1.5, %v491_v34  ;;  %v529_v37 = vmul.f32 %v895_v57, %v511_v41 }
 0x160   :  { %v555_v53 = vadd.f32 %v902_v1, %v537_v29  ;;  %v502_v27 = vsub.f32 1.5, %v501_v17 }
 0x161   :  { %573 = vst [vmem:[#allocation2 + $0x68] sm:$0xff] %v557_v0  ;;  %v493_v48 = vmul.f32 %v685_v30, %v492_v33  ;;  %v547_v50 = vadd.f32 %v902_v1, %v529_v37 }
 0x162   :  { %571 = vst [vmem:[#allocation2 + $0x58] sm:$0xff] %v555_v53  ;;  %v503_v43 = vmul.f32 %v687_v40, %v502_v27 }
 0x163   :  { %v497_v55 = vsel %vm496_vm14, %v685_v30, %v493_v48  ;;  %563 = vst [vmem:[#allocation2 + $0x18] sm:$0xff] %v547_v50 }
 0x164   :  { %v522_v58 = vmul.f32 %v497_v55, %v330_v47  ;;  %v507_v59 = vsel %vm506_vm0, %v687_v40, %v503_v43 }
 0x165   :  { %v523_v54 = vmul.f32 %v507_v59, %v331_v56 }
 0x166   :  { %v540_v23 = vmul.f32 %v895_v57, %v522_v58 }
 0x167   :  { %v541_v35 = vmul.f32 %v895_v57, %v523_v54 }
 0x168   :  { %v558_v38 = vadd.f32 %v902_v1, %v540_v23 }
 0x169   :  { %v559_v52 = vadd.f32 %v902_v1, %v541_v35 }
 0x16a   :  { %574 = vst [vmem:[#allocation2 + $0x70] sm:$0xff] %v558_v38 }
 0x16b   :  { %575 = vst [vmem:[#allocation2 + $0x78] sm:$0xff] %v559_v52 }
 0x16c   :  { %588 = dma.vmem_to_hbm [thread:$0]  %s581_s7, 2048, %s583_s10, [#allocation3], %s715_s11, %s715_s11, %s716_s12  }
 0x16d   :  { %712 = dma.done.wait [#allocation3], 2048  }
 0x16e   :  { %713 = vsyncadd [#allocation3], 4294965248 }
 0x16f   :  { %593 = vsyncpa [#allocation3], 1 }

</bundles_post_ra>
